<compile_context>
chip_gen: v7x
topology: tpu7x:2x2x1
jax: 0.10.0
libtpu: 0.0.40
codegen_flags: <defaults>
</compile_context>

<pallas_src>
import math
from functools import partial

import jax
import jax.numpy as jnp
from jax import lax
from jax.experimental import pallas as pl
from jax.experimental.pallas import tpu as pltpu


def _pick_group_size(num_heads: int, head_dim: int, mxu_width: int = 256) -> int:
    """Largest divisor g of num_heads such that g*head_dim <= mxu_width."""
    best = 1
    for g in range(1, num_heads + 1):
        if num_heads % g == 0 and g * head_dim <= mxu_width:
            best = g
    return best


def prepare_attention_params(params, *, num_heads, group_size=None):
    """One-time weight preprocessing (do NOT re-run per forward call).

    * pre-transposes the nn.Linear [H_out, H_in] weights to W^T,
    * folds the 1/sqrt(head_dim) softmax scale into W_q^T and b_q,
    * slices weights per head-group -> [NG, H, G*hd] bf16,
    * packs the three biases into a single [NG, 3, G*hd] f32 array (1 DMA).
    """
    wq, bq = params["query"]
    wk, bk = params["key"]
    wv, bv = params["value"]
    H = wq.shape[0]
    assert H % num_heads == 0
    hd = H // num_heads
    if group_size is None:
        group_size = _pick_group_size(num_heads, hd)
    assert num_heads % group_size == 0
    ng = num_heads // group_size
    ghd = group_size * hd
    scale = 1.0 / math.sqrt(hd)

    def split_wt(w, s=1.0):
        wt = w.astype(jnp.float32).T * s                      # [H_in, H_out]
        return jnp.transpose(wt.reshape(H, ng, ghd), (1, 0, 2)).astype(jnp.bfloat16)

    def split_b(b, s=1.0):
        return (b.astype(jnp.float32) * s).reshape(ng, ghd)

    bias_packed = jnp.stack(
        [split_b(bq, scale), split_b(bk), split_b(bv)], axis=1)  # [NG, 3, G*hd]

    return dict(
        wqT=split_wt(wq, scale), wkT=split_wt(wk), wvT=split_wt(wv),
        bias=bias_packed, num_heads=num_heads, head_dim=hd,
        group_size=group_size, num_groups=ng, hidden=H,
    )


def _attn_group_kernel(
    x_ref,       # (1, S, H)       bf16  hidden states for this batch element
    wqt_ref,     # (1, H, G*hd)    bf16  head-group slice of W_q^T (scale folded)
    wkt_ref,     # (1, H, G*hd)    bf16  head-group slice of W_k^T
    wvt_ref,     # (1, H, G*hd)    bf16  head-group slice of W_v^T
    b_ref,       # (1, 3, G*hd)    f32   packed (bq*scale, bk, bv) group slice
    mask_ref,    # (1, 1, S)       f32   additive attention mask
    ctx_ref,     # (1, S, G*hd)          lane-dense context slab column slice
    *probs_refs,  # optionally ((1, G, S, S),) attention probs output
    group_size: int,
    head_dim: int,
):
    x = x_ref[0]                                              # [S, H]    bf16
    bqkv = b_ref[0]                                           # [3, G*hd] f32
    mask = mask_ref[0]                                        # [1, S]    f32

    # Grouped projections: N = G*hd fills the MXU (vs N = hd per head).
    # Softmax scale and bias for Q are already folded in by the prep step.
    q = jnp.dot(x, wqt_ref[0], preferred_element_type=jnp.float32) + bqkv[0:1]
    k = jnp.dot(x, wkt_ref[0], preferred_element_type=jnp.float32) + bqkv[1:2]
    v = jnp.dot(x, wvt_ref[0], preferred_element_type=jnp.float32) + bqkv[2:3]

    # Small, statically-unrolled per-head loop (G <= 4).
    for h in range(group_size):
        lo = h * head_dim
        hi = lo + head_dim
        qh = q[:, lo:hi].astype(jnp.bfloat16)
        kh = k[:, lo:hi].astype(jnp.bfloat16)
        vh = v[:, lo:hi].astype(jnp.bfloat16)

        # Q K^T as a contraction (no materialized K transpose), bf16 operands
        # with f32 accumulation on the MXU.
        s = lax.dot_general(qh, kh,
                            dimension_numbers=(((1,), (1,)), ((), ())),
                            preferred_element_type=jnp.float32)        # [S, S]
        s = s + mask

        # Numerically-stable softmax in f32; divide goes to the EUP slot.
        m = jnp.max(s, axis=-1, keepdims=True)
        e = jnp.exp(s - m)
        denom = jnp.sum(e, axis=-1, keepdims=True)
        p = e * pl.reciprocal(denom, approx=True)

        ctx_h = jnp.dot(p.astype(jnp.bfloat16), vh,
                        preferred_element_type=jnp.float32)            # [S, hd]
        ctx_ref[0, :, lo:hi] = ctx_h.astype(ctx_ref.dtype)
        if probs_refs:
            probs_refs[0][0, h] = p.astype(probs_refs[0].dtype)

    # TODO(synk): relative_key / relative_key_query position embeddings,
    # cross-attention / past_key_value cache concat, head_mask and decoder
    # past_key_value outputs are not used by this (absolute, encoder-only)
    # config and are not implemented.
    # TODO(synk): for very long sequences on v7x (64 MiB VMEM), tile the key
    # axis with a flash-style online softmax instead of materializing [S, S].


def roberta_self_attention(hidden_states, prepared, attention_mask, *,
                           output_attentions=False, probs_dtype=jnp.bfloat16):
    """hidden_states: [B, S, H] f32; attention_mask: additive mask [B, 1, S].

    `prepared` is the output of prepare_attention_params (one-time prep).
    Returns (context_layer[1,B,S,H],) or (context_layer, attention_probs).
    """
    B, S, H = hidden_states.shape
    assert H == prepared["hidden"]
    nh = prepared["num_heads"]
    hd = prepared["head_dim"]
    G = prepared["group_size"]
    ng = prepared["num_groups"]
    ghd = G * hd

    x_bf16 = hidden_states.astype(jnp.bfloat16)
    mask = attention_mask.astype(jnp.float32)

    in_specs = [
        pl.BlockSpec((1, S, H), lambda b, g: (b, 0, 0)),     # x (reused over g)
        pl.BlockSpec((1, H, ghd), lambda b, g: (g, 0, 0)),   # Wq^T group slice
        pl.BlockSpec((1, H, ghd), lambda b, g: (g, 0, 0)),   # Wk^T group slice
        pl.BlockSpec((1, H, ghd), lambda b, g: (g, 0, 0)),   # Wv^T group slice
        pl.BlockSpec((1, 3, ghd), lambda b, g: (g, 0, 0)),   # packed biases
        pl.BlockSpec((1, 1, S), lambda b, g: (b, 0, 0)),     # additive mask
    ]

    out_shape = [jax.ShapeDtypeStruct((B, S, H), jnp.float32)]
    out_specs = [pl.BlockSpec((1, S, ghd), lambda b, g: (b, 0, g))]
    if output_attentions:
        out_shape.append(jax.ShapeDtypeStruct((B, nh, S, S), probs_dtype))
        out_specs.append(pl.BlockSpec((1, G, S, S), lambda b, g: (b, g, 0, 0)))

    # Rough VMEM budget: double-buffered pipeline blocks + in-kernel temps.
    probs_blk = G * S * S * jnp.dtype(probs_dtype).itemsize if output_attentions else 0
    blk_bytes = (S * H * 2 + 3 * H * ghd * 2 + 3 * ghd * 4 + S * 4
                 + S * ghd * 4 + probs_blk)
    interm_bytes = 3 * S * ghd * 4 + 3 * S * S * 4
    vmem_limit = int(min(max(2 * blk_bytes + interm_bytes, 32 * 1024 * 1024),
                         96 * 1024 * 1024))

    flops = 6 * B * S * H * H + 4 * B * nh * S * S * hd
    bytes_accessed = (B * S * H * 2 + 3 * H * H * 2 + 3 * H * 4 + B * S * 4
                      + B * S * H * 4
                      + (B * nh * S * S * jnp.dtype(probs_dtype).itemsize
                         if output_attentions else 0))

    outs = pl.pallas_call(
        partial(_attn_group_kernel, group_size=G, head_dim=hd),
        out_shape=tuple(out_shape),
        grid_spec=pltpu.PrefetchScalarGridSpec(
            num_scalar_prefetch=0,
            grid=(B, ng),          # head-group axis innermost: x / mask block
            in_specs=in_specs,     # indices stay constant -> no re-DMA.
            out_specs=tuple(out_specs),
        ),
        compiler_params=pltpu.CompilerParams(
            dimension_semantics=("parallel", "parallel"),
            vmem_limit_bytes=vmem_limit),
        cost_estimate=pl.CostEstimate(
            flops=flops, transcendentals=B * nh * S * S,
            bytes_accessed=bytes_accessed),
    )(x_bf16, prepared["wqT"], prepared["wkT"], prepared["wvT"],
      prepared["bias"], mask)

    ctx = outs[0]                                             # [B, S, H]
    # Matches the module: [1] + shape[:-2] + [all_head_size]  (free reshape;
    # the head interleave is already correct because heads are written
    # head-major into the hidden dimension).
    context_layer = ctx.reshape(1, B, S, H)

    if output_attentions:
        return context_layer, outs[1]
    return (context_layer,)


def _reference(hidden_states, params, attention_mask, *, num_heads):
    """Pure-JAX f32 reference of the same forward pass (sanity check)."""
    B, S, H = hidden_states.shape
    hd = H // num_heads
    wq, bq = params["query"]
    wk, bk = params["key"]
    wv, bv = params["value"]

    def proj(w, b):
        y = jnp.einsum("bsh,oh->bso", hidden_states, w) + b
        return y.reshape(B, S, num_heads, hd).transpose(0, 2, 1, 3)  # [B,nh,S,hd]

    q, k, v = proj(wq, bq), proj(wk, bk), proj(wv, bv)
    scores = jnp.einsum("bhqd,bhkd->bhqk", q, k) / math.sqrt(hd)
    scores = scores + attention_mask[:, :, None, :]
    probs = jax.nn.softmax(scores, axis=-1)
    ctx = jnp.einsum("bhqk,bhkd->bhqd", probs, v)
    ctx = ctx.transpose(0, 2, 1, 3).reshape(1, B, S, H)
    return ctx, probs


if __name__ == "__main__":
    B, S, H = 2, 8, 32
    NUM_HEADS = 4

    key = jax.random.PRNGKey(0)
    k_x, k_wq, k_bq, k_wk, k_bk, k_wv, k_bv, k_m = jax.random.split(key, 8)

    hidden_states = jax.random.normal(k_x, (B, S, H), dtype=jnp.float32)
    params = {
        "query": (0.1 * jax.random.normal(k_wq, (H, H), jnp.float32),
                  0.1 * jax.random.normal(k_bq, (H,), jnp.float32)),
        "key": (0.1 * jax.random.normal(k_wk, (H, H), jnp.float32),
                0.1 * jax.random.normal(k_bk, (H,), jnp.float32)),
        "value": (0.1 * jax.random.normal(k_wv, (H, H), jnp.float32),
                  0.1 * jax.random.normal(k_bv, (H,), jnp.float32)),
    }
    # Additive attention mask [B, 1, S]: last two key positions of batch 1 masked.
    attention_mask = jnp.zeros((B, 1, S), jnp.float32)
    attention_mask = attention_mask.at[1, 0, -2:].set(-1e9)

    # One-time parameter preprocessing (per layer, not per call).
    prepared = prepare_attention_params(params, num_heads=NUM_HEADS)

    # Default (fast) path: context only.
    (ctx_only,) = roberta_self_attention(hidden_states, prepared, attention_mask)
    jax.block_until_ready(ctx_only)

    # Path with attention probs (bf16) for verification.
    ctx, probs = roberta_self_attention(
        hidden_states, prepared, attention_mask, output_attentions=True)
    jax.block_until_ready((ctx, probs))

    ctx_ref, probs_ref = _reference(
        hidden_states, params, attention_mask, num_heads=NUM_HEADS)

    # bf16 MXU operands with f32 accumulation (+ bf16 probs output, approx
    # reciprocal in softmax) -> looser tolerance than pure f32.
    assert jnp.allclose(ctx, ctx_ref, atol=2e-2, rtol=2e-2)
    assert jnp.allclose(ctx_only, ctx_ref, atol=2e-2, rtol=2e-2)
    assert jnp.allclose(probs.astype(jnp.float32), probs_ref, atol=2e-2, rtol=2e-2)

    print("KERNEL_OK")
</pallas_src>

<mosaic_0001>
module attributes {stable_mosaic.version = 11 : i64} {
  func.func @_attn_group_kernel(%arg0: i32, %arg1: i32, %arg2: memref<1x8x32xbf16, #tpu.memory_space<vmem>>, %arg3: memref<1x32x32xbf16, #tpu.memory_space<vmem>>, %arg4: memref<1x32x32xbf16, #tpu.memory_space<vmem>>, %arg5: memref<1x32x32xbf16, #tpu.memory_space<vmem>>, %arg6: memref<1x3x32xf32, #tpu.memory_space<vmem>>, %arg7: memref<1x1x8xf32, #tpu.memory_space<vmem>>, %arg8: memref<1x8x32xf32, #tpu.memory_space<vmem>>) attributes {dimension_semantics = [#tpu.dimension_semantics<parallel>, #tpu.dimension_semantics<parallel>], iteration_bounds = array<i64: 2, 1>, scalar_prefetch = 0 : i64, scratch_operands = 0 : i64, tpu.core_type = #tpu.core_type<tc>, window_params = [{transform_indices = @transform_0, window_bounds = array<i64: 1, 8, 32>}, {transform_indices = @transform_1, window_bounds = array<i64: 1, 32, 32>}, {transform_indices = @transform_2, window_bounds = array<i64: 1, 32, 32>}, {transform_indices = @transform_3, window_bounds = array<i64: 1, 32, 32>}, {transform_indices = @transform_4, window_bounds = array<i64: 1, 3, 32>}, {transform_indices = @transform_5, window_bounds = array<i64: 1, 1, 8>}, {transform_indices = @transform_6, window_bounds = array<i64: 1, 8, 32>}]} {
    %c0 = arith.constant 0 : index
    %c0_0 = arith.constant 0 : index
    %c0_1 = arith.constant 0 : index
    %0 = vector.load %arg2[%c0, %c0_0, %c0_1] : memref<1x8x32xbf16, #tpu.memory_space<vmem>>, vector<1x8x32xbf16>
    %1 = vector.shape_cast %0 : vector<1x8x32xbf16> to vector<8x32xbf16>
    %c0_2 = arith.constant 0 : index
    %c0_3 = arith.constant 0 : index
    %c0_4 = arith.constant 0 : index
    %2 = vector.load %arg6[%c0_2, %c0_3, %c0_4] : memref<1x3x32xf32, #tpu.memory_space<vmem>>, vector<1x3x32xf32>
    %3 = vector.shape_cast %2 : vector<1x3x32xf32> to vector<3x32xf32>
    %c0_5 = arith.constant 0 : index
    %c0_6 = arith.constant 0 : index
    %c0_7 = arith.constant 0 : index
    %4 = vector.load %arg7[%c0_5, %c0_6, %c0_7] : memref<1x1x8xf32, #tpu.memory_space<vmem>>, vector<1x1x8xf32>
    %5 = vector.shape_cast %4 : vector<1x1x8xf32> to vector<1x8xf32>
    %c0_8 = arith.constant 0 : index
    %c0_9 = arith.constant 0 : index
    %c0_10 = arith.constant 0 : index
    %6 = vector.load %arg3[%c0_8, %c0_9, %c0_10] : memref<1x32x32xbf16, #tpu.memory_space<vmem>>, vector<1x32x32xbf16>
    %7 = vector.shape_cast %6 : vector<1x32x32xbf16> to vector<32x32xbf16>
    %cst = arith.constant dense<0.000000e+00> : vector<8x32xf32>
    %8 = tpu.matmul %1, %7, %cst {dimension_numbers = #tpu.dot_dimension_numbers<[1], [0], [0], [1], [0, 0, 1, 1], [], []>} : vector<8x32xbf16>, vector<32x32xbf16>, vector<8x32xf32> -> vector<8x32xf32>
    %9 = vector.extract_strided_slice %3 {offsets = [0, 0], sizes = [1, 32], strides = [1, 1]} : vector<3x32xf32> to vector<1x32xf32>
    %10 = vector.broadcast %9 : vector<1x32xf32> to vector<8x32xf32>
    %11 = arith.addf %8, %10 : vector<8x32xf32>
    %c0_11 = arith.constant 0 : index
    %c0_12 = arith.constant 0 : index
    %c0_13 = arith.constant 0 : index
    %12 = vector.load %arg4[%c0_11, %c0_12, %c0_13] : memref<1x32x32xbf16, #tpu.memory_space<vmem>>, vector<1x32x32xbf16>
    %13 = vector.shape_cast %12 : vector<1x32x32xbf16> to vector<32x32xbf16>
    %cst_14 = arith.constant dense<0.000000e+00> : vector<8x32xf32>
    %14 = tpu.matmul %1, %13, %cst_14 {dimension_numbers = #tpu.dot_dimension_numbers<[1], [0], [0], [1], [0, 0, 1, 1], [], []>} : vector<8x32xbf16>, vector<32x32xbf16>, vector<8x32xf32> -> vector<8x32xf32>
    %15 = vector.extract_strided_slice %3 {offsets = [1, 0], sizes = [1, 32], strides = [1, 1]} : vector<3x32xf32> to vector<1x32xf32>
    %16 = vector.broadcast %15 : vector<1x32xf32> to vector<8x32xf32>
    %17 = arith.addf %14, %16 : vector<8x32xf32>
    %c0_15 = arith.constant 0 : index
    %c0_16 = arith.constant 0 : index
    %c0_17 = arith.constant 0 : index
    %18 = vector.load %arg5[%c0_15, %c0_16, %c0_17] : memref<1x32x32xbf16, #tpu.memory_space<vmem>>, vector<1x32x32xbf16>
    %19 = vector.shape_cast %18 : vector<1x32x32xbf16> to vector<32x32xbf16>
    %cst_18 = arith.constant dense<0.000000e+00> : vector<8x32xf32>
    %20 = tpu.matmul %1, %19, %cst_18 {dimension_numbers = #tpu.dot_dimension_numbers<[1], [0], [0], [1], [0, 0, 1, 1], [], []>} : vector<8x32xbf16>, vector<32x32xbf16>, vector<8x32xf32> -> vector<8x32xf32>
    %21 = vector.extract_strided_slice %3 {offsets = [2, 0], sizes = [1, 32], strides = [1, 1]} : vector<3x32xf32> to vector<1x32xf32>
    %22 = vector.broadcast %21 : vector<1x32xf32> to vector<8x32xf32>
    %23 = arith.addf %20, %22 : vector<8x32xf32>
    %24 = vector.extract_strided_slice %11 {offsets = [0, 0], sizes = [8, 8], strides = [1, 1]} : vector<8x32xf32> to vector<8x8xf32>
    %25 = arith.truncf %24 : vector<8x8xf32> to vector<8x8xbf16>
    %26 = vector.extract_strided_slice %17 {offsets = [0, 0], sizes = [8, 8], strides = [1, 1]} : vector<8x32xf32> to vector<8x8xf32>
    %27 = arith.truncf %26 : vector<8x8xf32> to vector<8x8xbf16>
    %28 = vector.extract_strided_slice %23 {offsets = [0, 0], sizes = [8, 8], strides = [1, 1]} : vector<8x32xf32> to vector<8x8xf32>
    %29 = arith.truncf %28 : vector<8x8xf32> to vector<8x8xbf16>
    %cst_19 = arith.constant dense<0.000000e+00> : vector<8x8xf32>
    %30 = tpu.matmul %25, %27, %cst_19 {dimension_numbers = #tpu.dot_dimension_numbers<[1], [1], [0], [0], [0, 0, 1, 0], [], []>} : vector<8x8xbf16>, vector<8x8xbf16>, vector<8x8xf32> -> vector<8x8xf32>
    %31 = vector.broadcast %5 : vector<1x8xf32> to vector<8x8xf32>
    %32 = arith.addf %30, %31 : vector<8x8xf32>
    %cst_20 = arith.constant dense<0xFF800000> : vector<8xf32>
    %33 = vector.multi_reduction <maximumf>, %32, %cst_20 [1] : vector<8x8xf32> to vector<8xf32>
    %34 = vector.shape_cast %33 : vector<8xf32> to vector<8x1xf32>
    %35 = vector.broadcast %34 : vector<8x1xf32> to vector<8x8xf32>
    %36 = arith.subf %32, %35 : vector<8x8xf32>
    %37 = math.exp %36 : vector<8x8xf32>
    %cst_21 = arith.constant dense<0.000000e+00> : vector<8xf32>
    %38 = vector.multi_reduction <add>, %37, %cst_21 [1] : vector<8x8xf32> to vector<8xf32>
    %39 = vector.shape_cast %38 : vector<8xf32> to vector<8x1xf32>
    %40 = tpu.reciprocal %39 {approx = true} : vector<8x1xf32> -> vector<8x1xf32>
    %41 = vector.broadcast %40 : vector<8x1xf32> to vector<8x8xf32>
    %42 = arith.mulf %37, %41 : vector<8x8xf32>
    %43 = arith.truncf %42 : vector<8x8xf32> to vector<8x8xbf16>
    %cst_22 = arith.constant dense<0.000000e+00> : vector<8x8xf32>
    %44 = tpu.matmul %43, %29, %cst_22 {dimension_numbers = #tpu.dot_dimension_numbers<[1], [0], [0], [1], [0, 0, 1, 1], [], []>} : vector<8x8xbf16>, vector<8x8xbf16>, vector<8x8xf32> -> vector<8x8xf32>
    %c0_23 = arith.constant 0 : index
    %c0_24 = arith.constant 0 : index
    %c0_25 = arith.constant 0 : index
    %45 = vector.load %arg8[%c0_23, %c0_24, %c0_25] : memref<1x8x32xf32, #tpu.memory_space<vmem>>, vector<1x8x8xf32>
    %46 = vector.shape_cast %45 : vector<1x8x8xf32> to vector<8x8xf32>
    %47 = vector.shape_cast %44 : vector<8x8xf32> to vector<1x8x8xf32>
    tpu.vector_store %arg8[%c0_23, %c0_24, %c0_25], %47 {strides = array<i32>} : memref<1x8x32xf32, #tpu.memory_space<vmem>>, vector<1x8x8xf32>,
    %48 = vector.extract_strided_slice %11 {offsets = [0, 8], sizes = [8, 8], strides = [1, 1]} : vector<8x32xf32> to vector<8x8xf32>
    %49 = arith.truncf %48 : vector<8x8xf32> to vector<8x8xbf16>
    %50 = vector.extract_strided_slice %17 {offsets = [0, 8], sizes = [8, 8], strides = [1, 1]} : vector<8x32xf32> to vector<8x8xf32>
    %51 = arith.truncf %50 : vector<8x8xf32> to vector<8x8xbf16>
    %52 = vector.extract_strided_slice %23 {offsets = [0, 8], sizes = [8, 8], strides = [1, 1]} : vector<8x32xf32> to vector<8x8xf32>
    %53 = arith.truncf %52 : vector<8x8xf32> to vector<8x8xbf16>
    %cst_26 = arith.constant dense<0.000000e+00> : vector<8x8xf32>
    %54 = tpu.matmul %49, %51, %cst_26 {dimension_numbers = #tpu.dot_dimension_numbers<[1], [1], [0], [0], [0, 0, 1, 0], [], []>} : vector<8x8xbf16>, vector<8x8xbf16>, vector<8x8xf32> -> vector<8x8xf32>
    %55 = vector.broadcast %5 : vector<1x8xf32> to vector<8x8xf32>
    %56 = arith.addf %54, %55 : vector<8x8xf32>
    %cst_27 = arith.constant dense<0xFF800000> : vector<8xf32>
    %57 = vector.multi_reduction <maximumf>, %56, %cst_27 [1] : vector<8x8xf32> to vector<8xf32>
    %58 = vector.shape_cast %57 : vector<8xf32> to vector<8x1xf32>
    %59 = vector.broadcast %58 : vector<8x1xf32> to vector<8x8xf32>
    %60 = arith.subf %56, %59 : vector<8x8xf32>
    %61 = math.exp %60 : vector<8x8xf32>
    %cst_28 = arith.constant dense<0.000000e+00> : vector<8xf32>
    %62 = vector.multi_reduction <add>, %61, %cst_28 [1] : vector<8x8xf32> to vector<8xf32>
    %63 = vector.shape_cast %62 : vector<8xf32> to vector<8x1xf32>
    %64 = tpu.reciprocal %63 {approx = true} : vector<8x1xf32> -> vector<8x1xf32>
    %65 = vector.broadcast %64 : vector<8x1xf32> to vector<8x8xf32>
    %66 = arith.mulf %61, %65 : vector<8x8xf32>
    %67 = arith.truncf %66 : vector<8x8xf32> to vector<8x8xbf16>
    %cst_29 = arith.constant dense<0.000000e+00> : vector<8x8xf32>
    %68 = tpu.matmul %67, %53, %cst_29 {dimension_numbers = #tpu.dot_dimension_numbers<[1], [0], [0], [1], [0, 0, 1, 1], [], []>} : vector<8x8xbf16>, vector<8x8xbf16>, vector<8x8xf32> -> vector<8x8xf32>
    %c0_30 = arith.constant 0 : index
    %c0_31 = arith.constant 0 : index
    %c8 = arith.constant 8 : index
    %69 = vector.load %arg8[%c0_30, %c0_31, %c8] : memref<1x8x32xf32, #tpu.memory_space<vmem>>, vector<1x8x8xf32>
    %70 = vector.shape_cast %69 : vector<1x8x8xf32> to vector<8x8xf32>
    %71 = vector.shape_cast %68 : vector<8x8xf32> to vector<1x8x8xf32>
    tpu.vector_store %arg8[%c0_30, %c0_31, %c8], %71 {strides = array<i32>} : memref<1x8x32xf32, #tpu.memory_space<vmem>>, vector<1x8x8xf32>,
    %72 = vector.extract_strided_slice %11 {offsets = [0, 16], sizes = [8, 8], strides = [1, 1]} : vector<8x32xf32> to vector<8x8xf32>
    %73 = arith.truncf %72 : vector<8x8xf32> to vector<8x8xbf16>
    %74 = vector.extract_strided_slice %17 {offsets = [0, 16], sizes = [8, 8], strides = [1, 1]} : vector<8x32xf32> to vector<8x8xf32>
    %75 = arith.truncf %74 : vector<8x8xf32> to vector<8x8xbf16>
    %76 = vector.extract_strided_slice %23 {offsets = [0, 16], sizes = [8, 8], strides = [1, 1]} : vector<8x32xf32> to vector<8x8xf32>
    %77 = arith.truncf %76 : vector<8x8xf32> to vector<8x8xbf16>
    %cst_32 = arith.constant dense<0.000000e+00> : vector<8x8xf32>
    %78 = tpu.matmul %73, %75, %cst_32 {dimension_numbers = #tpu.dot_dimension_numbers<[1], [1], [0], [0], [0, 0, 1, 0], [], []>} : vector<8x8xbf16>, vector<8x8xbf16>, vector<8x8xf32> -> vector<8x8xf32>
    %79 = vector.broadcast %5 : vector<1x8xf32> to vector<8x8xf32>
    %80 = arith.addf %78, %79 : vector<8x8xf32>
    %cst_33 = arith.constant dense<0xFF800000> : vector<8xf32>
    %81 = vector.multi_reduction <maximumf>, %80, %cst_33 [1] : vector<8x8xf32> to vector<8xf32>
    %82 = vector.shape_cast %81 : vector<8xf32> to vector<8x1xf32>
    %83 = vector.broadcast %82 : vector<8x1xf32> to vector<8x8xf32>
    %84 = arith.subf %80, %83 : vector<8x8xf32>
    %85 = math.exp %84 : vector<8x8xf32>
    %cst_34 = arith.constant dense<0.000000e+00> : vector<8xf32>
    %86 = vector.multi_reduction <add>, %85, %cst_34 [1] : vector<8x8xf32> to vector<8xf32>
    %87 = vector.shape_cast %86 : vector<8xf32> to vector<8x1xf32>
    %88 = tpu.reciprocal %87 {approx = true} : vector<8x1xf32> -> vector<8x1xf32>
    %89 = vector.broadcast %88 : vector<8x1xf32> to vector<8x8xf32>
    %90 = arith.mulf %85, %89 : vector<8x8xf32>
    %91 = arith.truncf %90 : vector<8x8xf32> to vector<8x8xbf16>
    %cst_35 = arith.constant dense<0.000000e+00> : vector<8x8xf32>
    %92 = tpu.matmul %91, %77, %cst_35 {dimension_numbers = #tpu.dot_dimension_numbers<[1], [0], [0], [1], [0, 0, 1, 1], [], []>} : vector<8x8xbf16>, vector<8x8xbf16>, vector<8x8xf32> -> vector<8x8xf32>
    %c0_36 = arith.constant 0 : index
    %c0_37 = arith.constant 0 : index
    %c16 = arith.constant 16 : index
    %93 = vector.load %arg8[%c0_36, %c0_37, %c16] : memref<1x8x32xf32, #tpu.memory_space<vmem>>, vector<1x8x8xf32>
    %94 = vector.shape_cast %93 : vector<1x8x8xf32> to vector<8x8xf32>
    %95 = vector.shape_cast %92 : vector<8x8xf32> to vector<1x8x8xf32>
    tpu.vector_store %arg8[%c0_36, %c0_37, %c16], %95 {strides = array<i32>} : memref<1x8x32xf32, #tpu.memory_space<vmem>>, vector<1x8x8xf32>,
    %96 = vector.extract_strided_slice %11 {offsets = [0, 24], sizes = [8, 8], strides = [1, 1]} : vector<8x32xf32> to vector<8x8xf32>
    %97 = arith.truncf %96 : vector<8x8xf32> to vector<8x8xbf16>
    %98 = vector.extract_strided_slice %17 {offsets = [0, 24], sizes = [8, 8], strides = [1, 1]} : vector<8x32xf32> to vector<8x8xf32>
    %99 = arith.truncf %98 : vector<8x8xf32> to vector<8x8xbf16>
    %100 = vector.extract_strided_slice %23 {offsets = [0, 24], sizes = [8, 8], strides = [1, 1]} : vector<8x32xf32> to vector<8x8xf32>
    %101 = arith.truncf %100 : vector<8x8xf32> to vector<8x8xbf16>
    %cst_38 = arith.constant dense<0.000000e+00> : vector<8x8xf32>
    %102 = tpu.matmul %97, %99, %cst_38 {dimension_numbers = #tpu.dot_dimension_numbers<[1], [1], [0], [0], [0, 0, 1, 0], [], []>} : vector<8x8xbf16>, vector<8x8xbf16>, vector<8x8xf32> -> vector<8x8xf32>
    %103 = vector.broadcast %5 : vector<1x8xf32> to vector<8x8xf32>
    %104 = arith.addf %102, %103 : vector<8x8xf32>
    %cst_39 = arith.constant dense<0xFF800000> : vector<8xf32>
    %105 = vector.multi_reduction <maximumf>, %104, %cst_39 [1] : vector<8x8xf32> to vector<8xf32>
    %106 = vector.shape_cast %105 : vector<8xf32> to vector<8x1xf32>
    %107 = vector.broadcast %106 : vector<8x1xf32> to vector<8x8xf32>
    %108 = arith.subf %104, %107 : vector<8x8xf32>
    %109 = math.exp %108 : vector<8x8xf32>
    %cst_40 = arith.constant dense<0.000000e+00> : vector<8xf32>
    %110 = vector.multi_reduction <add>, %109, %cst_40 [1] : vector<8x8xf32> to vector<8xf32>
    %111 = vector.shape_cast %110 : vector<8xf32> to vector<8x1xf32>
    %112 = tpu.reciprocal %111 {approx = true} : vector<8x1xf32> -> vector<8x1xf32>
    %113 = vector.broadcast %112 : vector<8x1xf32> to vector<8x8xf32>
    %114 = arith.mulf %109, %113 : vector<8x8xf32>
    %115 = arith.truncf %114 : vector<8x8xf32> to vector<8x8xbf16>
    %cst_41 = arith.constant dense<0.000000e+00> : vector<8x8xf32>
    %116 = tpu.matmul %115, %101, %cst_41 {dimension_numbers = #tpu.dot_dimension_numbers<[1], [0], [0], [1], [0, 0, 1, 1], [], []>} : vector<8x8xbf16>, vector<8x8xbf16>, vector<8x8xf32> -> vector<8x8xf32>
    %c0_42 = arith.constant 0 : index
    %c0_43 = arith.constant 0 : index
    %c24 = arith.constant 24 : index
    %117 = vector.load %arg8[%c0_42, %c0_43, %c24] : memref<1x8x32xf32, #tpu.memory_space<vmem>>, vector<1x8x8xf32>
    %118 = vector.shape_cast %117 : vector<1x8x8xf32> to vector<8x8xf32>
    %119 = vector.shape_cast %116 : vector<8x8xf32> to vector<1x8x8xf32>
    tpu.vector_store %arg8[%c0_42, %c0_43, %c24], %119 {strides = array<i32>} : memref<1x8x32xf32, #tpu.memory_space<vmem>>, vector<1x8x8xf32>,
    return
  }
  func.func @transform_0(%arg0: i32, %arg1: i32) -> (i32, i32, i32) {
    %c0_i32 = arith.constant 0 : i32
    %c0_i32_0 = arith.constant 0 : i32
    %c0_i32_1 = arith.constant 0 : i32
    return %arg0, %c0_i32, %c0_i32_0 : i32, i32, i32
  }
  func.func @transform_1(%arg0: i32, %arg1: i32) -> (i32, i32, i32) {
    %c0_i32 = arith.constant 0 : i32
    %c0_i32_0 = arith.constant 0 : i32
    %c0_i32_1 = arith.constant 0 : i32
    return %arg1, %c0_i32, %c0_i32_0 : i32, i32, i32
  }
  func.func @transform_2(%arg0: i32, %arg1: i32) -> (i32, i32, i32) {
    %c0_i32 = arith.constant 0 : i32
    %c0_i32_0 = arith.constant 0 : i32
    %c0_i32_1 = arith.constant 0 : i32
    return %arg1, %c0_i32, %c0_i32_0 : i32, i32, i32
  }
  func.func @transform_3(%arg0: i32, %arg1: i32) -> (i32, i32, i32) {
    %c0_i32 = arith.constant 0 : i32
    %c0_i32_0 = arith.constant 0 : i32
    %c0_i32_1 = arith.constant 0 : i32
    return %arg1, %c0_i32, %c0_i32_0 : i32, i32, i32
  }
  func.func @transform_4(%arg0: i32, %arg1: i32) -> (i32, i32, i32) {
    %c0_i32 = arith.constant 0 : i32
    %c0_i32_0 = arith.constant 0 : i32
    %c0_i32_1 = arith.constant 0 : i32
    return %arg1, %c0_i32, %c0_i32_0 : i32, i32, i32
  }
  func.func @transform_5(%arg0: i32, %arg1: i32) -> (i32, i32, i32) {
    %c0_i32 = arith.constant 0 : i32
    %c0_i32_0 = arith.constant 0 : i32
    %c0_i32_1 = arith.constant 0 : i32
    return %arg0, %c0_i32, %c0_i32_0 : i32, i32, i32
  }
  func.func @transform_6(%arg0: i32, %arg1: i32) -> (i32, i32, i32) {
    %c0_i32 = arith.constant 0 : i32
    %c0_i32_0 = arith.constant 0 : i32
    return %arg0, %c0_i32, %arg1 : i32, i32, i32
  }
}

</mosaic_0001>

<bundles_post_ra>
// kernel: tpu_custom_call.1
= control target key start
LH: loop header
LB: loop body
LE: loop exit
PB: predicated region body
PF: predicated region fallthrough
CT: control target
= control target key end

     0   :  { %11 = vsyncpa [#allocation3], 0  ;;  %s2015_s0 = inlined_call_operand.hbm [shape: bf16[2,8,32], index: 0, kind: input, shape index: {}]   ;;  %s2016_s1 = inlined_call_operand.hbm [shape: bf16[1,32,32], index: 1, kind: input, shape index: {}]   ;;  %s2017_s2 = inlined_call_operand.hbm [shape: bf16[1,32,32], index: 2, kind: input, shape index: {}]   ;;  %s2018_s3 = inlined_call_operand.vmem [shape: bf16[1,32,32], index: 3, kind: input, shape index: {}]   ;;  %s2019_s4 = inlined_call_operand.vmem [shape: f32[1,3,32], index: 4, kind: input, shape index: {}]   ;;  %s2020_s5 = inlined_call_operand.vmem [shape: f32[2,1,8], index: 5, kind: input, shape index: {}]   ;;  %s2021_s6 = inlined_call_operand.hbm [shape: f32[2,8,32], index: 6, kind: output, shape index: {}]  }
   0x1   :  { %13 = vsyncpa [#allocation3 + $0x1], 0 }
   0x2   :  { %14 = vsyncpa [#allocation6], 0 }
   0x3   :  { %15 = vsyncpa [#allocation4], 0 }
   0x4   :  { %17 = vsyncpa [#allocation4 + $0x1], 0  ;;  %s1660_s21 = smov 0   ;;  %s1662_s22 = smov 0  }
   0x5   :  { %s1664_s23 = smov 0   ;;  %s1666_s24 = smov 0  }
   0x6   :  { %s1668_s25 = smov 0   ;;  %s1670_s26 = smov 0  }
   0x7 LB: > { %s1188_s27 = sadd.s32 4294967295, %s1609_s26   ;;  %s1189_s28 = sadd.s32 4294967294, %s1609_s26   ;;  %s1609_s26 = sphi %s1670_s26, %s23_s26   ;;  %s1605_s25 = sphi %s1668_s25, %s2046_s25   ;;  %s1601_s24 = sphi %s1666_s24, %s2045_s24   ;;  %s1597_s23 = sphi %s1664_s23, %s2044_s23   ;;  %s1593_s22 = sphi %s1662_s22, %s2043_s22   ;;  %s1589_s21 = sphi %s1660_s21, %s2042_s21  }
   0x8   : > { %p55_p0 = scmp.ne.s32.totalorder %s1593_s22, %s1589_s21  ;;  %p1694_p1 = scmp.eq.s32.totalorder %s1188_s27, 0 }
   0x9   : > { %p1698_p2 = scmp.eq.s32.totalorder %s1188_s27, 1  ;;  %p217_p3 = scmp.eq.s32.totalorder %s1189_s28, 1 }
   0xa   : > { %s2027_s29 = scalar_select %p1694_p1, 1, 0 }
   0xb   : > { %p1704_p4 = por %p1694_p1, %p55_p0  ;;  %p1190_p5 = scmp.ge.s32.totalorder %s1609_s26, 1 }
   0xc   : > { %p1709_p6 = por %p217_p3, %p55_p0  ;;  %p224_p7 = scmp.lt.s32.totalorder %s1609_s26, 3 }
   0xd   : > { %s2029_s7 = scalar_select %p1704_p4, 1, 0 }
   0xe   : > { %s2030_s8 = scalar_select %p1709_p6, 1, 0 }
   0xf   : > { %p1714_p8 = pnand %p1190_p5, %p224_p7  ;;  %s1611_s10 = smov [#allocation5]  }
  0x10   : > { %2031 = sst [smem:[#allocation12_spill]] %s2030_s8  ;;  %s239_s11 = sshll.u32 %s1611_s10, 4  ;;  %s1718_s11 = int_to_ptr.vmem [resolvable:$true] %s239_s11 }
  0x11   : > { %p1334_p9 = pneg %p1714_p8  ;;  %s1612_s13 = smov [#allocation7]  }
  0x12   : > { %s255_s14 = sshll.u32 %s1612_s13, 4  ;;  %s1437_s17 = scalar_lea.hbm %s2016_s1, 256  ;;  %s1729_s14 = int_to_ptr.vmem [resolvable:$true] %s255_s14 }
  0x13   : > { %p1725_p11 = pnand %p1334_p9, %p1694_p1  ;;  %p1438_p12 = scmp.ne.s32.totalorder %s2016_s1, %s1437_s17 }
  0x14   : > { %p1444_p5 = scmp.lt.u32.totalorder %s1437_s17, %s2016_s1 }
  0x15   : > { %p1439_p13 = pneg %p1725_p11 }
  0x17   : > { %p1440_p0 = pnand %p1439_p13, %p1438_p12 }
  0x19   : > { %p1441_p3 = pneg %p1440_p0 }
  0x1b   : > { %p1446_p7 = pnand %p1444_p5, %p1441_p3 }
  0x1d   : > { %1449 = shalt.err (!%p1446_p7)
}
  0x1e   : > { %s1450_s28 = scalar_lea.vmem %s1718_s11, 256  ;;  %p1458_p1 = scmp.lt.s32.totalorder %s1718_s11, %s1718_s11 }
  0x1f   : > { %p1451_p9 = scmp.ne.s32.totalorder %s1718_s11, %s1450_s28  ;;  %p1459_p12 = scmp.lt.s32.totalorder %s1450_s28, %s1450_s28 }
  0x21   : > { %p1453_p10 = pnand %p1451_p9, %p1439_p13  ;;  %p1460_p0 = por %p1459_p12, %p1458_p1 }
  0x23   : > { %p1454_p6 = pneg %p1453_p10 }
  0x25   : > { %p1461_p4 = pnand %p1460_p0, %p1454_p6 }
  0x27   : > { %1464 = shalt.err (!%p1461_p4)
}
  0x28   : > { %s1613_s10 = smov 64   ;;  %s1614_s13 = smov 4  }
  0x29   : > { %1337 = dma.hbm_to_vmem [thread:$0]  (!%p1725_p11), %s2016_s1, 256, %s1718_s11, [#allocation6], %s1613_s10, %s1613_s10, %s1614_s13  }
  0x2a   : > { %s1465_s19 = scalar_lea.hbm %s2017_s2, 256 }
  0x2b   : > { %p1466_p1 = scmp.ne.s32.totalorder %s2017_s2, %s1465_s19  ;;  %p1472_p10 = scmp.lt.u32.totalorder %s1465_s19, %s2017_s2 }
  0x2d   : > { %p1468_p4 = pnand %p1466_p1, %p1439_p13 }
  0x2f   : > { %p1469_p6 = pneg %p1468_p4 }
  0x31   : > { %p1474_p3 = pnand %p1472_p10, %p1469_p6 }
  0x33   : > { %1477 = shalt.err (!%p1474_p3)
}
  0x34   : > { %s1478_s11 = scalar_lea.vmem %s1729_s14, 256  ;;  %p1486_p12 = scmp.lt.s32.totalorder %s1729_s14, %s1729_s14 }
  0x35   : > { %p1479_p5 = scmp.ne.s32.totalorder %s1729_s14, %s1478_s11  ;;  %p1487_p0 = scmp.lt.s32.totalorder %s1478_s11, %s1478_s11 }
  0x37   : > { %p1481_p7 = pnand %p1479_p5, %p1439_p13  ;;  %p1488_p1 = por %p1487_p0, %p1486_p12 }
  0x39   : > { %p1482_p9 = pneg %p1481_p7 }
  0x3b   : > { %p1489_p4 = pnand %p1488_p1, %p1482_p9 }
  0x3d   : > { %1492 = shalt.err (!%p1489_p4)
}
  0x3e   : > { %1340 = dma.hbm_to_vmem [thread:$0]  (!%p1725_p11), %s2017_s2, 256, %s1729_s14, [#allocation6], %s1613_s10, %s1613_s10, %s1614_s13  }
  0x3f   : > { %s35_s16 = sadd.s32 1, %s1605_s25  ;;  %s42_s17 = sadd.s32 1, %s1597_s23 }
  0x40   : > { %p37_p13 = scmp.ge.s32.totalorder %s35_s16, 2  ;;  %p49_p6 = scmp.ne.s32.totalorder %s1597_s23, %s1593_s22 }
  0x41   : > { %p50_p10 = scmp.eq.s32.totalorder %s1609_s26, 0  ;;  %p1351_p3 = scmp.lt.s32.totalorder %s1609_s26, 2 }
  0x42   : > { %s2048_s16 = smov (%p37_p13, %s35_s16), 0  ;;  %p1793_p7 = por %p1698_p2, %p49_p6 }
  0x43   : > { %p51_p5 = por %p50_p10, %p49_p6  ;;  %s39_s18 = ssub.s32 %s1605_s25, %s2048_s16 }
  0x44   : > { %s2034_s12 = scalar_select %p1793_p7, 1, 0 }
  0x45   : > { %s284_s19 = sand.u32 1, %s1597_s23   ;;  %p40_p9 = scmp.eq.s32.totalorder %s39_s18, 0 }
  0x46   : > { %s1196_s14 = sshll.u32 %s284_s19, 2  ;;  %s1197_s10 = sshll.u32 %s1605_s25, 6 }
  0x47   : > { %s1802_s13 = scalar_select %p40_p9, %s1597_s23, %s42_s17  }
  0x48   : > { %s1807_s28 = scalar_lea.hbm %s2015_s0, %s1197_s10  ;;  %s288_s30 = scalar_lea.vmem [#allocation2], %s1196_s14 }
  0x49   : > { %s295_s11 = sshll.u32 %s288_s30, 4  ;;  %p1811_p2 = pnand %p1351_p3, %p51_p5  ;;  %s1815_s11 = int_to_ptr.vmem [resolvable:$true] %s295_s11 }
  0x4a   : > { %s285_s15 = scalar_lea.sflag [#allocation3], %s284_s19  ;;  %s1493_s17 = scalar_lea.hbm %s1807_s28, 64 }
  0x4b   : > { %p1494_p11 = scmp.ne.s32.totalorder %s1807_s28, %s1493_s17  ;;  %p1495_p12 = pneg %p1811_p2 }
  0x4c   : > { %s1498_s10 = scalar_lea.hbm %s2015_s0, 128  ;;  %p1499_p4 = scmp.lt.u32.totalorder %s1807_s28, %s2015_s0 }
  0x4d   : > { %p1496_p0 = pnand %p1495_p12, %p1494_p11  ;;  %p1500_p13 = scmp.lt.u32.totalorder %s1498_s10, %s1493_s17 }
  0x4e   : > { %p1502_p10 = scmp.lt.u32.totalorder %s1493_s17, %s1807_s28 }
  0x4f   : > { %p1497_p1 = pneg %p1496_p0  ;;  %p1501_p6 = por %p1500_p13, %p1499_p4 }
  0x51   : > { %p1503_p3 = por %p1502_p10, %p1501_p6 }
  0x53   : > { %p1504_p5 = pnand %p1503_p3, %p1497_p1 }
  0x55   : > { %1507 = shalt.err (!%p1504_p5)
}
  0x56   : > { %s1508_s19 = scalar_lea.vmem %s1815_s11, 64  ;;  %s1615_s30 = smov [#allocation2]  }
  0x57   : > { %p1509_p9 = scmp.ne.s32.totalorder %s1815_s11, %s1508_s19  ;;  %s1513_s18 = sshll.u32 %s1615_s30, 4  ;;  %s1514_s18 = int_to_ptr.vmem [resolvable:$false] %s1513_s18 }
  0x58   : > { %s1515_s14 = scalar_lea.vmem %s1514_s18, 128  ;;  %p1516_p7 = scmp.lt.s32.totalorder %s1815_s11, %s1514_s18 }
  0x59   : > { %p1511_p11 = pnand %p1509_p9, %p1495_p12  ;;  %p1517_p4 = scmp.lt.s32.totalorder %s1515_s14, %s1508_s19 }
  0x5b   : > { %p1512_p0 = pneg %p1511_p11  ;;  %p1518_p13 = por %p1517_p4, %p1516_p7 }
  0x5d   : > { %p1519_p6 = pnand %p1518_p13, %p1512_p0 }
  0x5f   : > { %1522 = shalt.err (!%p1519_p6)
}
  0x60   : > { %1344 = dma.hbm_to_vmem [thread:$0]  (!%p1811_p2), %s1807_s28, 64, %s1815_s11, %s285_s15  }
  0x61   : > { %310 = sbr.rel (%p1714_p8) target bundleno = 1345 (0x541), region = 44  ;;  %s1845_s17 = sand.u32 (!%p1714_p8), 1, %s1593_s22  }
  0x62   : > { %s1199_s10 = sshll.u32 (!%p1714_p8), %s1845_s17, 2  ;;  %s313_s20 = scalar_lea.sflag (!%p1714_p8), [#allocation3], %s1845_s17 }
  0x63   : > { %s316_s27 = scalar_lea.vmem (!%p1714_p8), [#allocation2], %s1199_s10  ;;  %p2036_p7 = scmp.ne.s32.totalorder (!%p1714_p8), %s2029_s7, 0 }
  0x68   : > { %1576 = dma.done.wait (%p2036_p7), %s313_s20, 64  }
  0x69   : > { %1578 = vsyncadd (%p2036_p7), %s313_s20, 4294967232  ;;  %p2037_p12 = scmp.ne.s32.totalorder %s2027_s29, 0 }
  0x6b   : > { %1580 = dma.done.wait (%p2037_p12), [#allocation6], 512  }
  0x6c   : > { %1582 = vsyncadd (%p2037_p12), [#allocation6], 4294966784  ;;  %v1616_v0 = vmov 0.0   ;;  %vm1617_vm0 = vmmov 0   ;;  %v1415_v1 = vld [vmem:[#allocation7] sm:$0xff]   ;;  %v1416_v2 = vld [vmem:[#allocation5] sm:$0xff]   ;;  %v385_v6 = vlaneseq }
  0x6d   : > { %1258 = vmatprep.subr.bf16.mxu1 %v1616_v0  ;;  %1250 = vmatprep.subr.bf16.mxu0 %v1616_v0  ;;  %v1417_v3 = vld [vmem:[#allocation7 + $0x8] sm:$0xff]   ;;  %v1418_v4 = vld [vmem:[#allocation5 + $0x8] sm:$0xff]   ;;  %vm401_vm1 = vcmask 261120   ;;  %vm574_vm2 = vcmask 64512   ;;  %s1618_s9 = smov 112   ;;  %s1619_s28 = smov 120  }
  0x6e   : > { %1262 = vmatprep.mubr.msk.bf16.mxu1 %vm1617_vm0, %v1616_v0  ;;  %1254 = vmatprep.mubr.msk.bf16.mxu0 %vm1617_vm0, %v1616_v0  ;;  %v378_v5 = vld [vmem:[%s316_s27] sm:$0xf]  ;;  %v1873_v7 = vshrl.u32 %v385_v6, 7  ;;  %s1620_s11 = smov 104   ;;  %v1420_v27 = vld [vmem:[%s2018_s3 + $0x8] sm:$0xff]   ;;  %p374_p8 = scmp.lt.s32.totalorder %s1601_s24, 1 }
  0x6f   : > { %1259 = vmatpush3.bf16.msra.mxu1 %v1415_v1  ;;  %1251 = vmatpush3.bf16.msra.mxu0 %v1416_v2  ;;  %v1879_v9 = vld [vmem:[%s2019_s4] sm:$0x7]  ;;  %vm636_vm3 = vcmask 1043456   ;;  %s1202_s27 = sshll.u32 %s1845_s17, 3  ;;  %s1621_s7 = smov 8   ;;  %vm798_vm4 = vcmask 130112  }
  0x70   : > { %1260 = vmatprep.subr.bf16.mxu1 %v1616_v0  ;;  %1252 = vmatprep.subr.bf16.mxu0 %v1616_v0  ;;  %v451_v8 = vsub.s32 1, %v1873_v7  ;;  %v387_v10 = vsub.s32 0, %v1873_v7  ;;  %v1419_v26 = vld [vmem:[%s2018_s3] sm:$0xff]   ;;  %s375_s18 = scalar_select %p374_p8, %s1601_s24, 1  ;;  %v511_v44 = vsub.s32 2, %v1873_v7  ;;  %vm914_vm5 = vcmask 195712  }
  0x71   : > { %s1954_s29 = scalar_lea.vmem [#allocation8], %s1202_s27  ;;  %vm1030_vm6 = vcmask 261312   ;;  %p2038_p1 = scmp.ne.s32.totalorder %s2034_s12, 0 }
  0x72   : > { %v452_v11 = vrot.slane %v1879_v9, %v451_v8  ;;  %v388_v12 = vrot.slane %v1879_v9, %v387_v10  ;;  %s376_s20 = scalar_lea.vmem %s2020_s5, %s375_s18  ;;  %v512_v45 = vrot.slane %v1879_v9, %v511_v44  ;;  %s1047_s8 = sshll.u32 %s1954_s29, 4  ;;  %s1967_s8 = int_to_ptr.vmem [resolvable:$true] %s1047_s8 }
  0x73   : > { %1261 = vmatpush3.bf16.msra.mxu1 %v1417_v3  ;;  %1253 = vmatpush3.bf16.msra.mxu0 %v1418_v4  ;;  %v1212_v37 = vld [vmem:[%s376_s20] ss:$0 sm:$0xff]  ;;  %s1033_s18 = scalar_lea.sflag [#allocation4], %s1845_s17  ;;  %s1523_s14 = scalar_lea.vmem %s1967_s8, 128 }
  0x74   : > { %1274 = vmatprep.subr.bf16.mxu1 %v1616_v0  ;;  %1266 = vmatprep.subr.bf16.mxu0 %v1616_v0  ;;  %p1524_p2 = scmp.ne.s32.totalorder %s1967_s8, %s1523_s14 }
  0x76   : > { %1263 = vmatmul.mubr.msk.bf16.vlgmr.msra.gmra.mrb[0].mxu1 %vm401_vm1, %v378_v5  ;;  %1255 = vmatmul.mubr.msk.bf16.vlgmr.msra.gmra.mrb[0].mxu0 %vm401_vm1, %v378_v5  ;;  %p1525_p10 = pnand %p1524_p2, %p2038_p1 }
  0x77   : > { %1276 = vmatprep.mubr.msk.bf16.mxu1 %vm1617_vm0, %v1616_v0  ;;  %1270 = vmatprep.mubr.msk.bf16.mxu0 %vm1617_vm0, %v1616_v0 }
  0x78   : > { %1267 = vmatpush3.bf16.msra.mxu0 %v1419_v26  ;;  %p1526_p3 = pneg %p1525_p10 }
  0x79   : > { %1268 = vmatprep.subr.bf16.mxu0 %v1616_v0 }
  0x7c   : > { %1269 = vmatpush3.bf16.msra.mxu0 %v1420_v27 }
  0x7d   : > { %1280 = vmatprep.subr.bf16.mxu0 %v1616_v0 }
  0x7f   : > { %1271 = vmatmul.mubr.msk.bf16.vlgmr.msra.gmra.mrb[4].mxu0 %vm401_vm1, %v378_v5 }
  0x80   : > { %1282 = vmatprep.mubr.msk.bf16.mxu0 %vm1617_vm0, %v1616_v0 }
 0x149   : > { %v499_v13 = vpop.f32.mrb[0].mxu1  ;;  %v439_v16 = vpop.f32.mrb[0].mxu0 }
 0x14a   : > { %v500_v14 = vadd.f32 %v499_v13, %v452_v11  ;;  %v1264_v15 = vpop.f32.mrb[1].mxu1  ;;  %v440_v18 = vadd.f32 %v439_v16, %v388_v12  ;;  %v1256_v19 = vpop.f32.mrb[1].mxu0 }
 0x14b   : > { %v502_v17 = vpop.f32.mrb[2].mxu1  ;;  %v442_v22 = vpop.f32.mrb[2].mxu0 }
 0x14c   : > { %v566_v20 = vpack.c.bf16 %v500_v14, %v500_v14  ;;  %v1265_v21 = vpop.f32.mrb[3].mxu1  ;;  %v1257_v23 = vpop.f32.mrb[3].mxu0  ;;  %v565_v24 = vpack.c.bf16 %v440_v18, %v440_v18 }
 0x14e   : > { %802 = vrot.lane.b32.xlu1 %v566_v20, %s1618_s9  ;;  %685 = vrot.lane.b32.xlu0 %v566_v20, %s1619_s28  ;;  %v579_v25 = vsel %vm574_vm2, %v566_v20, 0 }
 0x14f   : > { %1275 = vmatpush3.bf16.xpose.msra.mxu1 %v579_v25 }
 0x150   : > { %1286 = vmatprep.subr.bf16.mxu1 %v1616_v0 }
 0x152   : > { %800 = vrot.lane.b32.xlu1 %v565_v24, %s1618_s9  ;;  %682 = vrot.lane.b32.xlu0 %v565_v24, %s1619_s28  ;;  %v559_v46 = vpop.f32.mrb[4].mxu0 }
 0x153   : > { %v560_v47 = vadd.f32 %v559_v46, %v512_v45  ;;  %v1272_v48 = vpop.f32.mrb[5].mxu0 }
 0x154   : > { %v562_v49 = vpop.f32.mrb[6].mxu0 }
 0x155   : > { %v567_v50 = vpack.c.bf16 %v560_v47, %v560_v47  ;;  %v1273_v51 = vpop.f32.mrb[7].mxu0 }
 0x156   : > { %916 = vrot.lane.b32.xlu1 %v565_v24, %s1620_s11  ;;  %918 = vrot.lane.b32.xlu0 %v566_v20, %s1620_s11 }
 0x157   : > { %1277 = vmatmul.mubr.msk.bf16.vlgmr.msra.gmra.mrb[4].mxu1 %vm574_vm2, %v565_v24  ;;  %v638_v52 = vsel %vm636_vm3, %v567_v50, 0 }
 0x158   : > { %1288 = vmatprep.mubr.msk.bf16.mxu1 %vm1617_vm0, %v1616_v0  ;;  %1281 = vmatpush3.bf16.msra.mxu0 %v638_v52 }
 0x159   : > { %1292 = vmatprep.subr.bf16.mxu0 %v1616_v0 }
 0x1c0   : > { %v686_v28 = vpop.permute.xlu0 %685  ;;  %v803_v30 = vpop.permute.xlu1 %802 }
 0x1c1   : > { %v691_v29 = vsel %vm574_vm2, %v686_v28, 0  ;;  %v808_v32 = vsel %vm574_vm2, %v803_v30, 0 }
 0x1c2   : > { %1287 = vmatpush3.bf16.xpose.msra.mxu1 %v691_v29 }
 0x1c3   : > { %1298 = vmatprep.subr.bf16.mxu1 %v1616_v0 }
 0x1c4   : > { %v683_v31 = vpop.permute.xlu0 %682  ;;  %v801_v34 = vpop.permute.xlu1 %800 }
 0x1c8   : > { %v919_v33 = vpop.permute.xlu0 %918  ;;  %v917_v36 = vpop.permute.xlu1 %916 }
 0x1c9   : > { %1289 = vmatmul.mubr.msk.bf16.vlgmr.msra.gmra.mrb[8].mxu1 %vm574_vm2, %v683_v31  ;;  %v924_v35 = vsel %vm574_vm2, %v919_v33, 0 }
 0x1ca   : > { %1299 = vmatpush3.bf16.xpose.msra.mxu1 %v808_v32  ;;  %1300 = vmatprep.mubr.msk.bf16.mxu1 %vm1617_vm0, %v1616_v0 }
 0x1cb   : > { %1310 = vmatprep.subr.bf16.mxu1 %v1616_v0 }
 0x1d1   : > { %1301 = vmatmul.mubr.msk.bf16.vlgmr.msra.gmra.mrb[12].mxu1 %vm574_vm2, %v801_v34 }
 0x1d2   : > { %1311 = vmatpush3.bf16.xpose.msra.mxu1 %v924_v35  ;;  %1312 = vmatprep.mubr.msk.bf16.mxu1 %vm1617_vm0, %v1616_v0 }
 0x1d9   : > { %1313 = vmatmul.mubr.msk.bf16.vlgmr.msra.gmra.mrb[16].mxu1 %vm574_vm2, %v917_v36 }
 0x22a   : > { %v615_v38 = vpop.f32.mrb[4].mxu1 }
 0x22b   : > { %v616_v39 = vadd.f32 %v1212_v37, %v615_v38  ;;  %v1278_v40 = vpop.f32.mrb[5].mxu1 }
 0x22c   : > { %v618_v41 = vpop.f32.mrb[6].mxu1 }
 0x22d   : > { %v1279_v42 = vpop.f32.mrb[7].mxu1  ;;  %v621_v43 = vsel %vm574_vm2, %v616_v39, -inf }
 0x22e   : > { %622 = vmax.xlane.f32.xlu0 %v621_v43 }
 0x29c   : > { %v727_v53 = vpop.f32.mrb[8].mxu1 }
 0x29d   : > { %v728_v54 = vadd.f32 %v1212_v37, %v727_v53  ;;  %v1290_v55 = vpop.f32.mrb[9].mxu1 }
 0x29e   : > { %v730_v56 = vpop.f32.mrb[10].mxu1 }
 0x29f   : > { %v1291_v57 = vpop.f32.mrb[11].mxu1  ;;  %v733_v58 = vsel %vm574_vm2, %v728_v54, -inf }
 0x2a0   : > { %734 = vmax.xlane.f32.xlu1 %v733_v58 }
 0x2a4   : > { %v844_v59 = vpop.f32.mrb[12].mxu1 }
 0x2a5   : > { %v845_v60 = vadd.f32 %v1212_v37, %v844_v59  ;;  %v1302_v61 = vpop.f32.mrb[13].mxu1 }
 0x2a6   : > { %v847_v62 = vpop.f32.mrb[14].mxu1 }
 0x2a7   : > { %v1303_v63 = vpop.f32.mrb[15].mxu1  ;;  %v850_v1 = vsel %vm574_vm2, %v845_v60, -inf }
 0x2a8   : > { %851 = vmax.xlane.f32.xlu0 %v850_v1 }
 0x2ac   : > { %v960_v2 = vpop.f32.mrb[16].mxu1 }
 0x2ad   : > { %v961_v3 = vadd.f32 %v1212_v37, %v960_v2  ;;  %v1314_v4 = vpop.f32.mrb[17].mxu1 }
 0x2ae   : > { %v963_v5 = vpop.f32.mrb[18].mxu1 }
 0x2af   : > { %v1315_v6 = vpop.f32.mrb[19].mxu1  ;;  %v966_v7 = vsel %vm574_vm2, %v961_v3, -inf }
 0x2b0   : > { %967 = vmax.xlane.f32.xlu0 %v966_v7 }
 0x2bb   : > { %v623_v8 = vpop.xlane.xlu0 %622 }
 0x2bc   : > { %v624_v9 = vsub.f32 %v616_v39, %v623_v8 }
 0x2be   : > { %v625_v10 = vmul.f32 1.442695, %v624_v9 }
 0x2c0   : > { %1421 = vpow2.f32 %v625_v10 }
 0x2ca   : > { %v1422_v11 = vpop.eup %1421 }
 0x2cb   : > { %v627_v12 = vsel %vm574_vm2, %v1422_v11, 0.0 }
 0x2cc   : > { %628 = vadd.xlane.f32.xlu1 %v627_v12 }
 0x2dd   : > { %746 = vrot.lane.b32.xlu1 %v567_v50, %s1619_s28  ;;  %s1623_s28 = smov 24  }
 0x32d   : > { %v735_v13 = vpop.xlane.xlu1 %734 }
 0x32e   : > { %v736_v14 = vsub.f32 %v728_v54, %v735_v13 }
 0x330   : > { %v737_v15 = vmul.f32 1.442695, %v736_v14 }
 0x332   : > { %1423 = vpow2.f32 %v737_v15 }
 0x335   : > { %v852_v16 = vpop.xlane.xlu0 %851 }
 0x336   : > { %v853_v17 = vsub.f32 %v845_v60, %v852_v16 }
 0x338   : > { %v854_v18 = vmul.f32 1.442695, %v853_v17 }
 0x33a   : > { %1425 = vpow2.f32 %v854_v18 }
 0x33c   : > { %v1424_v19 = vpop.eup %1423 }
 0x33d   : > { %v968_v20 = vpop.xlane.xlu0 %967  ;;  %v739_v21 = vsel %vm574_vm2, %v1424_v19, 0.0 }
 0x33e   : > { %v969_v22 = vsub.f32 %v961_v3, %v968_v20  ;;  %740 = vadd.xlane.f32.xlu0 %v739_v21 }
 0x340   : > { %v970_v23 = vmul.f32 1.442695, %v969_v22 }
 0x342   : > { %1427 = vpow2.f32 %v970_v23 }
 0x344   : > { %v1426_v24 = vpop.eup %1425 }
 0x345   : > { %v856_v25 = vsel %vm574_vm2, %v1426_v24, 0.0 }
 0x346   : > { %857 = vadd.xlane.f32.xlu1 %v856_v25 }
 0x34c   : > { %v1428_v26 = vpop.eup %1427 }
 0x34d   : > { %v972_v27 = vsel %vm574_vm2, %v1428_v26, 0.0 }
 0x34e   : > { %973 = vadd.xlane.f32.xlu0 %v972_v27 }
 0x357   : > { %978 = vrot.lane.b32.xlu1 %v567_v50, %s1620_s11  ;;  %s1222_s11 = sshll.u32 %s1601_s24, 7  ;;  %s1624_s24 = smov [#allocation8]  }
 0x358   : > { %s1965_s30 = scalar_lea.hbm %s2021_s6, %s1222_s11  ;;  %s1527_s10 = sshll.u32 %s1624_s24, 4  ;;  %s1528_s10 = int_to_ptr.vmem [resolvable:$false] %s1527_s10 }
 0x359   : > { %v629_v28 = vpop.xlane.xlu1 %628  ;;  %s1529_s20 = scalar_lea.vmem %s1528_s10, 256  ;;  %p1530_p5 = scmp.lt.s32.totalorder %s1967_s8, %s1528_s10 }
 0x35a   : > { %1429 = vrcp.f32 %v629_v28  ;;  %p1531_p9 = scmp.lt.s32.totalorder %s1529_s20, %s1523_s14 }
 0x35c   : > { %p1532_p11 = por %p1531_p9, %p1530_p5 }
 0x35d   : > { %v747_v30 = vpop.permute.xlu1 %746 }
 0x35e   : > { %v752_v33 = vsel %vm636_vm3, %v747_v30, 0  ;;  %p1533_p0 = pnand %p1532_p11, %p1526_p3 }
 0x364   : > { %v1430_v29 = vpop.eup %1429  ;;  %862 = vrot.lane.b32.xlu0 %v567_v50, %s1618_s9  ;;  %s1622_s9 = smov 16  }
 0x365   : > { %v631_v31 = vmul.f32 %v1430_v29, %v1422_v11 }
 0x367   : > { %v632_v32 = vpack.c.bf16 %v631_v31, %v631_v31 }
 0x369   : > { %1283 = vmatmul.mubr.msk.bf16.vlgmr.msra.gmra.mrb[8].mxu0 %vm574_vm2, %v632_v32 }
 0x36a   : > { %1293 = vmatpush3.bf16.msra.mxu0 %v752_v33  ;;  %1294 = vmatprep.mubr.msk.bf16.mxu0 %vm1617_vm0, %v1616_v0 }
 0x36b   : > { %1304 = vmatprep.subr.bf16.mxu0 %v1616_v0 }
 0x3cb   : > { %v741_v34 = vpop.xlane.xlu0 %740 }
 0x3cc   : > { %1431 = vrcp.f32 %v741_v34 }
 0x3d3   : > { %v858_v35 = vpop.xlane.xlu1 %857 }
 0x3d4   : > { %1433 = vrcp.f32 %v858_v35 }
 0x3d6   : > { %v1432_v36 = vpop.eup %1431 }
 0x3d7   : > { %v743_v37 = vmul.f32 %v1432_v36, %v1424_v19  ;;  %v979_v44 = vpop.permute.xlu1 %978 }
 0x3d8   : > { %v984_v46 = vsel %vm636_vm3, %v979_v44, 0 }
 0x3d9   : > { %v744_v38 = vpack.c.bf16 %v743_v37, %v743_v37 }
 0x3db   : > { %v974_v39 = vpop.xlane.xlu0 %973  ;;  %1295 = vmatmul.mubr.msk.bf16.vlgmr.msra.gmra.mrb[12].mxu0 %vm574_vm2, %v744_v38 }
 0x3dc   : > { %1435 = vrcp.f32 %v974_v39  ;;  %1306 = vmatprep.mubr.msk.bf16.mxu0 %vm1617_vm0, %v1616_v0 }
 0x3de   : > { %v1434_v40 = vpop.eup %1433 }
 0x3df   : > { %v860_v41 = vmul.f32 %v1434_v40, %v1426_v24  ;;  %v863_v42 = vpop.permute.xlu0 %862 }
 0x3e0   : > { %v868_v43 = vsel %vm636_vm3, %v863_v42, 0 }
 0x3e1   : > { %1305 = vmatpush3.bf16.msra.mxu0 %v868_v43  ;;  %v861_v45 = vpack.c.bf16 %v860_v41, %v860_v41 }
 0x3e2   : > { %1316 = vmatprep.subr.bf16.mxu0 %v1616_v0 }
 0x3e4   : > { %1307 = vmatmul.mubr.msk.bf16.vlgmr.msra.gmra.mrb[16].mxu0 %vm574_vm2, %v861_v45 }
 0x3e5   : > { %1317 = vmatpush3.bf16.msra.mxu0 %v984_v46  ;;  %1318 = vmatprep.mubr.msk.bf16.mxu0 %vm1617_vm0, %v1616_v0 }
 0x3e6   : > { %v1436_v47 = vpop.eup %1435 }
 0x3e7   : > { %v976_v48 = vmul.f32 %v1436_v47, %v1428_v26 }
 0x3e9   : > { %v977_v49 = vpack.c.bf16 %v976_v48, %v976_v48 }
 0x3ec   : > { %1319 = vmatmul.mubr.msk.bf16.vlgmr.msra.gmra.mrb[20].mxu0 %vm574_vm2, %v977_v49 }
 0x43c   : > { %v674_v50 = vpop.f32.mrb[8].mxu0 }
 0x43d   : > { %680 = vst.msk [vmem:[%s1954_s29] sm:$0xff] %vm574_vm2, %v674_v50  ;;  %v1284_v51 = vpop.f32.mrb[9].mxu0 }
 0x43e   : > { %v677_v52 = vpop.f32.mrb[10].mxu0 }
 0x43f   : > { %v1285_v53 = vpop.f32.mrb[11].mxu0 }
 0x4ae   : > { %v788_v54 = vpop.f32.mrb[12].mxu0 }
 0x4af   : > { %795 = vrot.lane.b32.xlu1 %v788_v54, %s1621_s7  ;;  %v1296_v55 = vpop.f32.mrb[13].mxu0 }
 0x4b0   : > { %v791_v0 = vpop.f32.mrb[14].mxu0 }
 0x4b1   : > { %v1297_v56 = vpop.f32.mrb[15].mxu0 }
 0x4b7   : > { %v904_v57 = vpop.f32.mrb[16].mxu0 }
 0x4b8   : > { %911 = vrot.lane.b32.xlu0 %v904_v57, %s1622_s9  ;;  %v1308_v58 = vpop.f32.mrb[17].mxu0 }
 0x4b9   : > { %v907_v59 = vpop.f32.mrb[18].mxu0 }
 0x4ba   : > { %v1309_v60 = vpop.f32.mrb[19].mxu0 }
 0x4bf   : > { %v1020_v61 = vpop.f32.mrb[20].mxu0 }
 0x4c0   : > { %1027 = vrot.lane.b32.xlu1 %v1020_v61, %s1623_s28  ;;  %v1320_v62 = vpop.f32.mrb[21].mxu0 }
 0x4c1   : > { %v1023_v63 = vpop.f32.mrb[22].mxu0 }
 0x4c2   : > { %v1321_v1 = vpop.f32.mrb[23].mxu0 }
 0x521   : > { %v796_v2 = vpop.permute.xlu1 %795 }
 0x522   : > { %799 = vst.msk [vmem:[%s1954_s29] sm:$0xff] %vm798_vm4, %v796_v2 }
 0x52a   : > { %v912_v3 = vpop.permute.xlu0 %911 }
 0x52b   : > { %915 = vst.msk [vmem:[%s1954_s29] sm:$0xff] %vm914_vm5, %v912_v3 }
 0x532   : > { %v1028_v4 = vpop.permute.xlu1 %1027 }
 0x533   : > { %1031 = vst.msk [vmem:[%s1954_s29] sm:$0xff] %vm1030_vm6, %v1028_v4 }
 0x534   : > { %1536 = shalt.err (!%p1533_p0)
}
 0x535   : > { %s1537_s17 = scalar_lea.hbm %s1965_s30, 128  ;;  %s1541_s7 = scalar_lea.hbm %s2021_s6, 256 }
 0x536   : > { %p1538_p4 = scmp.ne.s32.totalorder %s1965_s30, %s1537_s17  ;;  %p1542_p7 = scmp.lt.u32.totalorder %s1965_s30, %s2021_s6 }
 0x537   : > { %p1543_p12 = scmp.lt.u32.totalorder %s1541_s7, %s1537_s17  ;;  %p1545_p2 = scmp.lt.u32.totalorder %s1537_s17, %s1965_s30 }
 0x538   : > { %p1539_p13 = pnand %p1538_p4, %p2038_p1 }
 0x539   : > { %p1544_p8 = por %p1543_p12, %p1542_p7 }
 0x53a   : > { %p1540_p6 = pneg %p1539_p13 }
 0x53b   : > { %p1546_p10 = por %p1545_p2, %p1544_p8 }
 0x53d   : > { %p1547_p3 = pnand %p1546_p10, %p1540_p6 }
 0x53f   : > { %1550 = shalt.err (!%p1547_p3)
}
 0x540   : > { %1332 = dma.vmem_to_hbm [thread:$0]  (%p2038_p1), %s1967_s8, 128, %s1965_s30, %s1033_s18  }
 0x541 PF: > { %s2039_s11 = sld [smem:[#allocation12_spill]]  ;;  %s1059_s15 = sand.u32 1, %s1589_s21  }
 0x542   : > { %p2041_p9 = scmp.ge.s32.totalorder %s1609_s26, 2  ;;  %s1060_s19 = scalar_lea.sflag [#allocation4], %s1059_s15 }
 0x547   : > { %p2040_p5 = scmp.ne.s32.totalorder %s2039_s11, 0 }
 0x549   : > { %p1346_p11 = pnand %p2041_p9, %p2040_p5 }
 0x54b   : > { %1584 = dma.done.wait (!%p1346_p11), %s1060_s19, 128  }
 0x54c   : > { %1586 = vsyncadd (!%p1346_p11), %s1060_s19, 4294967168  ;;  %s23_s26 = sadd.s32 1, %s1609_s26   ;;  %s2042_s21 = smov %s1593_s22 }
 0x54d   : > { %p20_p0 = scmp.ge.s32.totalorder %s23_s26, 4   ;;  %s2043_s22 = smov %s1597_s23 }
 0x54e   : > { %s2044_s23 = smov %s1802_s13  ;;  %s2045_s24 = smov %s1605_s25 }
 0x54f   : > { %s2046_s25 = smov %s2048_s16  ;;  %22 = sbr.rel (!%p20_p0) target bundleno = 7 (0x7), region = 108 }
 0x556   :  { %1065 = vsyncpa [#allocation3], 1 }
 0x557   :  { %1067 = vsyncpa [#allocation3 + $0x1], 1 }
 0x558   :  { %1068 = vsyncpa [#allocation6], 1 }
 0x559   :  { %1069 = vsyncpa [#allocation4], 1 }
 0x55a   :  { %1071 = vsyncpa [#allocation4 + $0x1], 1 }

</bundles_post_ra>
